<compile_context>
chip_gen: v6e
topology: v6e:2x2x1
jax: 0.10.0
libtpu: 0.0.40
codegen_flags: <defaults>
</compile_context>

<pallas_src>
import jax
import jax.numpy as jnp
from jax.experimental import pallas as pl
from jax.experimental.pallas import tpu as pltpu


def cross_attn_kernel(v_ref, wvt_ref, wot_ref, bo_ref, o_ref):
    """One (batch-tile, L-tile) output block per grid step.

    v_ref   : (N, E)        full value input, resident in VMEM
    wvt_ref : (E, C)        values_proj weight, pre-transposed
    wot_ref : (C, C)        out Conv1d(k=1) weight, pre-transposed
    bo_ref  : (1, C)        out bias as a lane-dense row
    o_ref   : (b_tile, C, l_tile)
    """
    b_tile, C, l_tile = o_ref.shape
    nb = pl.program_id(0)

    start = nb * b_tile
    if b_tile > 1:
        start = pl.multiple_of(start, b_tile)
    vb = v_ref[pl.ds(start, b_tile), :]                                   # (B, E)

    # values projection + output projection (+ bias), batched over the tile.
    vp = jnp.dot(vb, wvt_ref[...], preferred_element_type=jnp.float32)    # (B, C)
    y = jnp.dot(vp, wot_ref[...], preferred_element_type=jnp.float32)     # (B, C)
    y = y + bo_ref[...]                                                   # (B, C)

    # Attention with a single repeated key/value vector has exactly uniform
    # softmax weights, so the per-position output equals y broadcast over L.
    # Single lane-broadcast + one big unmasked store per grid step.
    o_ref[...] = jnp.broadcast_to(y[:, :, None],
                                  (b_tile, C, l_tile)).astype(o_ref.dtype)


def _pick_l_tile(L: int, cap: int = 1024) -> int:
    """Lane-dense output tiles: multiple of 128 when L allows, else full L."""
    if L <= cap or L % 128 != 0:
        return L
    for t in (1024, 512, 256, 128):
        if L % t == 0:
            return t
    return L


def cross_attention(q, k, v, wq, wk, wv, wo, bo, heads, *, b_tile=1):
    """Forward pass of the CrossAttention module.

    q : (N, C, L), k/v : (N, E).  q, wq, k, wk only define shapes — they are
    mathematically irrelevant to the output (see derivation above).
    """
    N, C, L = q.shape
    E = v.shape[-1]
    assert C % heads == 0, "channels must be divisible by heads"
    assert N % b_tile == 0, "batch must be divisible by the batch tile"

    # q / Wq / k / Wk are dead compute for this module's forward (uniform
    # softmax); only their shapes/dtypes matter.
    del wq, wk, k

    # One-time wrapper-side layout plumbing (no in-kernel transposes).
    wvt = wv.T                    # (E, C)
    wot = wo.T                    # (C, C)
    bo2 = bo.reshape(1, C)        # lane-dense bias row

    l_tile = _pick_l_tile(L)
    grid = (N // b_tile, L // l_tile)

    return pl.pallas_call(
        cross_attn_kernel,
        out_shape=jax.ShapeDtypeStruct((N, C, L), q.dtype),
        grid_spec=pltpu.PrefetchScalarGridSpec(
            num_scalar_prefetch=0,
            grid=grid,
            in_specs=[
                pl.BlockSpec((N, E), lambda nb, lb: (0, 0)),   # v    (resident)
                pl.BlockSpec((E, C), lambda nb, lb: (0, 0)),   # Wv^T (resident)
                pl.BlockSpec((C, C), lambda nb, lb: (0, 0)),   # Wo^T (resident)
                pl.BlockSpec((1, C), lambda nb, lb: (0, 0)),   # bias row
            ],
            out_specs=pl.BlockSpec((b_tile, C, l_tile),
                                   lambda nb, lb: (nb, 0, lb)),
        ),
        compiler_params=pltpu.CompilerParams(
            dimension_semantics=("parallel", "parallel")),
    )(v, wvt, wot, bo2)


def cross_attention_reference(q, k, v, wq, wk, wv, wo, bo, heads):
    """Pure-JAX reference mirroring the PyTorch forward op-for-op."""
    N, C, L = q.shape
    D = C // heads
    qp = jnp.einsum('oc,ncl->nol', wq, q)               # Conv1d k=1, no bias
    kp = k @ wk.T                                       # (N, C)
    vp = v @ wv.T                                       # (N, C)
    qh = qp.transpose(0, 2, 1).reshape(N, L, heads, D)  # n l h d
    kh = kp.reshape(N, heads, D)
    vh = vp.reshape(N, heads, D)
    kr = jnp.broadcast_to(kh[:, None], (N, L, heads, D))
    vr = jnp.broadcast_to(vh[:, None], (N, L, heads, D))
    qk = jnp.einsum('nqhd,nkhd->nhqk', qh, kr)
    attn = jax.nn.softmax(qk * (C ** -0.5), axis=3)
    out = jnp.einsum('nhql,nlhd->nqhd', attn, vr)
    oc = out.reshape(N, L, C).transpose(0, 2, 1)        # n (h d) l
    return jnp.einsum('oc,ncl->nol', wo, oc) + bo[None, :, None]


if __name__ == "__main__":
    N, C, E, L, H = 2, 16, 32, 16, 4   # batch, channels, label_emb_dim, seq, heads

    key = jax.random.PRNGKey(0)
    ks = jax.random.split(key, 8)
    q = jax.random.normal(ks[0], (N, C, L), jnp.float32)
    k = jax.random.normal(ks[1], (N, E), jnp.float32)
    v = jax.random.normal(ks[2], (N, E), jnp.float32)
    # synthetic parameters (shapes from the module __init__)
    wq = jax.random.normal(ks[3], (C, C), jnp.float32) * 0.1   # queries_proj (Conv1d k=1)
    wk = jax.random.normal(ks[4], (C, E), jnp.float32) * 0.1   # keys_proj   (Linear)
    wv = jax.random.normal(ks[5], (C, E), jnp.float32) * 0.1   # values_proj (Linear)
    wo = jax.random.normal(ks[6], (C, C), jnp.float32) * 0.1   # out (Conv1d k=1)
    bo = jax.random.normal(ks[7], (C,), jnp.float32) * 0.1     # out bias

    out = cross_attention(q, k, v, wq, wk, wv, wo, bo, H)
    jax.block_until_ready(out)

    ref = cross_attention_reference(q, k, v, wq, wk, wv, wo, bo, H)
    assert out.shape == (N, C, L)
    assert jnp.allclose(out, ref, atol=1e-4, rtol=1e-4), "mismatch vs reference"

    print("KERNEL_OK")
</pallas_src>

<mosaic_0001>
module attributes {stable_mosaic.version = 11 : i64} {
  func.func @cross_attn_kernel(%arg0: i32, %arg1: i32, %arg2: memref<2x32xf32, #tpu.memory_space<vmem>>, %arg3: memref<32x16xf32, #tpu.memory_space<vmem>>, %arg4: memref<16x16xf32, #tpu.memory_space<vmem>>, %arg5: memref<1x16xf32, #tpu.memory_space<vmem>>, %arg6: memref<1x16x16xf32, #tpu.memory_space<vmem>>) attributes {dimension_semantics = [#tpu.dimension_semantics<parallel>, #tpu.dimension_semantics<parallel>], iteration_bounds = array<i64: 2, 1>, scalar_prefetch = 0 : i64, scratch_operands = 0 : i64, tpu.core_type = #tpu.core_type<tc>, window_params = [{pipeline_mode = #tpu.pipeline_mode<synchronous>, transform_indices = @transform_0, window_bounds = array<i64: 2, 32>}, {pipeline_mode = #tpu.pipeline_mode<synchronous>, transform_indices = @transform_1, window_bounds = array<i64: 32, 16>}, {pipeline_mode = #tpu.pipeline_mode<synchronous>, transform_indices = @transform_2, window_bounds = array<i64: 16, 16>}, {pipeline_mode = #tpu.pipeline_mode<synchronous>, transform_indices = @transform_3, window_bounds = array<i64: 1, 16>}, {transform_indices = @transform_4, window_bounds = array<i64: 1, 16, 16>}]} {
    %c1_i32 = arith.constant 1 : i32
    %0 = arith.muli %arg0, %c1_i32 : i32
    %1 = arith.index_cast %0 : i32 to index
    %c0 = arith.constant 0 : index
    %2 = vector.load %arg2[%1, %c0] : memref<2x32xf32, #tpu.memory_space<vmem>>, vector<1x32xf32>
    %c0_0 = arith.constant 0 : index
    %c0_1 = arith.constant 0 : index
    %3 = vector.load %arg3[%c0_0, %c0_1] : memref<32x16xf32, #tpu.memory_space<vmem>>, vector<32x16xf32>
    %cst = arith.constant dense<0.000000e+00> : vector<1x16xf32>
    %4 = tpu.matmul %2, %3, %cst {dimension_numbers = #tpu.dot_dimension_numbers<[1], [0], [0], [1], [0, 0, 1, 1], [], []>} : vector<1x32xf32>, vector<32x16xf32>, vector<1x16xf32> -> vector<1x16xf32>
    %c0_2 = arith.constant 0 : index
    %c0_3 = arith.constant 0 : index
    %5 = vector.load %arg4[%c0_2, %c0_3] : memref<16x16xf32, #tpu.memory_space<vmem>>, vector<16x16xf32>
    %cst_4 = arith.constant dense<0.000000e+00> : vector<1x16xf32>
    %6 = tpu.matmul %4, %5, %cst_4 {dimension_numbers = #tpu.dot_dimension_numbers<[1], [0], [0], [1], [0, 0, 1, 1], [], []>} : vector<1x16xf32>, vector<16x16xf32>, vector<1x16xf32> -> vector<1x16xf32>
    %c0_5 = arith.constant 0 : index
    %c0_6 = arith.constant 0 : index
    %7 = vector.load %arg5[%c0_5, %c0_6] : memref<1x16xf32, #tpu.memory_space<vmem>>, vector<1x16xf32>
    %8 = arith.addf %6, %7 : vector<1x16xf32>
    %9 = vector.shape_cast %8 : vector<1x16xf32> to vector<1x16x1xf32>
    %10 = vector.shape_cast %9 : vector<1x16x1xf32> to vector<1x16x1xf32>
    %11 = vector.broadcast %10 : vector<1x16x1xf32> to vector<1x16x16xf32>
    %c0_7 = arith.constant 0 : index
    %c0_8 = arith.constant 0 : index
    %c0_9 = arith.constant 0 : index
    %12 = vector.load %arg6[%c0_7, %c0_8, %c0_9] : memref<1x16x16xf32, #tpu.memory_space<vmem>>, vector<1x16x16xf32>
    tpu.vector_store %arg6[%c0_7, %c0_8, %c0_9], %11 {strides = array<i32>} : memref<1x16x16xf32, #tpu.memory_space<vmem>>, vector<1x16x16xf32>,
    return
  }
  func.func @transform_0(%arg0: i32, %arg1: i32) -> (i32, i32) {
    %c0_i32 = arith.constant 0 : i32
    %c0_i32_0 = arith.constant 0 : i32
    %c0_i32_1 = arith.constant 0 : i32
    return %c0_i32, %c0_i32_0 : i32, i32
  }
  func.func @transform_1(%arg0: i32, %arg1: i32) -> (i32, i32) {
    %c0_i32 = arith.constant 0 : i32
    %c0_i32_0 = arith.constant 0 : i32
    %c0_i32_1 = arith.constant 0 : i32
    return %c0_i32, %c0_i32_0 : i32, i32
  }
  func.func @transform_2(%arg0: i32, %arg1: i32) -> (i32, i32) {
    %c0_i32 = arith.constant 0 : i32
    %c0_i32_0 = arith.constant 0 : i32
    %c0_i32_1 = arith.constant 0 : i32
    return %c0_i32, %c0_i32_0 : i32, i32
  }
  func.func @transform_3(%arg0: i32, %arg1: i32) -> (i32, i32) {
    %c0_i32 = arith.constant 0 : i32
    %c0_i32_0 = arith.constant 0 : i32
    %c0_i32_1 = arith.constant 0 : i32
    return %c0_i32, %c0_i32_0 : i32, i32
  }
  func.func @transform_4(%arg0: i32, %arg1: i32) -> (i32, i32, i32) {
    %c0_i32 = arith.constant 0 : i32
    %c0_i32_0 = arith.constant 0 : i32
    return %arg0, %c0_i32, %arg1 : i32, i32, i32
  }
}

</mosaic_0001>

<bundles_post_ra>
// kernel: tpu_custom_call.1
= control target key start
LH: loop header
LB: loop body
LE: loop exit
PB: predicated region body
PF: predicated region fallthrough
CT: control target
= control target key end

     0   :  { %9 = vsyncpa [#allocation3], 0  ;;  %s779_s0 = inlined_call_operand.vmem [shape: f32[2,32], index: 0, kind: input, shape index: {}]   ;;  %s780_s1 = inlined_call_operand.vmem [shape: f32[32,16], index: 1, kind: input, shape index: {}]   ;;  %s781_s2 = inlined_call_operand.vmem [shape: f32[16,16], index: 2, kind: input, shape index: {}]   ;;  %s782_s3 = inlined_call_operand.vmem [shape: f32[1,16], index: 3, kind: input, shape index: {}]   ;;  %s783_s4 = inlined_call_operand.hbm [shape: f32[2,16,16], index: 4, kind: output, shape index: {}]  }
   0x1   :  { %11 = vsyncpa [#allocation3 + $0x1], 0  ;;  %s642_s15 = smov 0   ;;  %s644_s16 = smov 0  }
   0x2   :  { %s646_s17 = smov 0   ;;  %s648_s18 = smov 0  }
   0x3   :  { %s650_s19 = smov 0   ;;  %s652_s20 = smov 0  }
   0x4 LB: > { %s436_s21 = sadd.s32 4294967295, %s610_s20   ;;  %s437_s22 = sadd.s32 4294967294, %s610_s20   ;;  %s610_s20 = sphi %s652_s20, %s17_s20   ;;  %s606_s19 = sphi %s650_s19, %s790_s19   ;;  %s602_s18 = sphi %s648_s18, %s789_s18   ;;  %s598_s17 = sphi %s646_s17, %s788_s17   ;;  %s594_s16 = sphi %s644_s16, %s787_s16   ;;  %s590_s15 = sphi %s642_s15, %s786_s15  }
   0x5   : > { %s29_s23 = sadd.s32 1, %s606_s19  ;;  %s122_s24 = sadd.s32 1, %s598_s17 }
   0x6   : > { %p31_p0 = scmp.ge.s32.totalorder %s29_s23, 2  ;;  %p132_p1 = scmp.ne.s32.totalorder %s598_s17, %s594_s16 }
   0x7   : > { %p133_p2 = scmp.eq.s32.totalorder %s436_s21, 1  ;;  %p138_p3 = scmp.ne.s32.totalorder %s594_s16, %s590_s15 }
   0x8   : > { %s792_s23 = smov (%p31_p0, %s29_s23), 0  ;;  %p139_p5 = scmp.eq.s32.totalorder %s437_s22, 1 }
   0x9   : > { %p682_p4 = por %p133_p2, %p132_p1  ;;  %s117_s26 = ssub.s32 %s606_s19, %s792_s23 }
   0xa   : > { %p439_p6 = scmp.ge.s32.totalorder %s610_s20, 1  ;;  %p120_p7 = scmp.eq.s32.totalorder %s117_s26, 0 }
   0xb   : > { %p689_p8 = por %p139_p5, %p138_p3  ;;  %p169_p9 = scmp.lt.s32.totalorder %s610_s20, 3 }
   0xc   : > { %s695_s28 = scalar_select %p120_p7, %s598_s17, %s122_s24  }
   0xd   : > { %p170_p10 = pnand %p439_p6, %p169_p9 }
   0xe   : > { %s190_s13 = scalar_lea.vmem (!%p170_p10), %s779_s0, %s602_s18  ;;  %s187_s30 = sand.u32 (!%p170_p10), 1, %s594_s16  }
   0xf   : > { %173 = sbr.rel (%p170_p10) target bundleno = 552 (0x228), region = 36  ;;  %s440_s5 = sshll.u32 (!%p170_p10), %s187_s30, 4 }
  0x10   : > { %s189_s6 = scalar_lea.vmem (!%p170_p10), [#allocation2], %s440_s5  ;;  %s448_s8 = sshll.u32 (!%p170_p10), %s602_s18, 8 }
  0x11   : > { %s375_s7 = sshll.u32 (!%p170_p10), %s189_s6, 4  ;;  %s731_s11 = scalar_lea.hbm (!%p170_p10), %s783_s4, %s448_s8  ;;  %s726_s7 = int_to_ptr.vmem [resolvable:$true] %s375_s7 }
  0x12   : > { %s734_s12 = scalar_lea.sflag (!%p170_p10), [#allocation3], %s187_s30  ;;  %s614_s18 = smov (!%p170_p10), [#allocation2]  }
  0x13   : > { %s538_s14 = sshll.u32 (!%p170_p10), %s614_s18, 4  ;;  %s539_s14 = int_to_ptr.vmem [resolvable:$false] %s538_s14 }
  0x14   : > { %v195_v0 = vld [vmem:[%s780_s1 + $0x18] sm:$0xff]  ;;  %v612_v1 = vmov 0.0   ;;  %v194_v2 = vld [vmem:[%s780_s1 + $0x10] sm:$0xff]  ;;  %vm613_vm0 = vmmov 0   ;;  %v271_v3 = vld [vmem:[%s781_s2 + $0x8] sm:$0xff]  ;;  %vm196_vm1 = vcmask 261120   ;;  %v347_v10 = vlaneseq  ;;  %p541_p0 = scmp.lt.s32.totalorder %s726_s7, %s539_s14 }
  0x15   : > { %457 = vmatprep.subr.mxu0 %v612_v1  ;;  %465 = vmatprep.mubr.msk.f32.mxu0 %vm613_vm0, %v612_v1  ;;  %v193_v4 = vld [vmem:[%s780_s1 + $0x8] sm:$0xff]  ;;  %v192_v5 = vld [vmem:[%s780_s1] sm:$0xff]  ;;  %vm273_vm2 = vcmask 130048   ;;  %s540_s21 = scalar_lea.vmem %s539_s14, 512 }
  0x16   : > { %458 = vmatpush3.msra.mxu0 %v195_v0  ;;  %468 = vmatprep.subr.mxu1 %v612_v1  ;;  %v191_v6 = vld [vmem:[%s190_s13] sm:$0x1]  ;;  %v348_v11 = vshrl.u32 %v347_v10, 7  ;;  %s534_s13 = scalar_lea.vmem %s726_s7, 256 }
  0x17   : > { %459 = vmatprep.subr.mxu0 %v612_v1  ;;  %469 = vmatpush3.msra.mxu1 %v271_v3  ;;  %v270_v7 = vld [vmem:[%s781_s2] sm:$0xff]  ;;  %p535_p11 = scmp.ne.s32.totalorder %s726_s7, %s534_s13  ;;  %p542_p1 = scmp.lt.s32.totalorder %s540_s21, %s534_s13 }
  0x18   : > { %460 = vmatpush3.msra.mxu0 %v194_v2  ;;  %470 = vmatprep.subr.mxu1 %v612_v1  ;;  %v272_v12 = vld [vmem:[%s782_s3] sm:$0x1]  ;;  %v349_v13 = vsub.s32 0, %v348_v11 }
  0x19   : > { %461 = vmatprep.subr.mxu0 %v612_v1  ;;  %472 = vmatprep.mubr.msk.f32.mxu1 %vm613_vm0, %v612_v1  ;;  %p536_p12 = pnand %p535_p11, %p682_p4  ;;  %p543_p2 = por %p542_p1, %p541_p0 }
  0x1a   : > { %462 = vmatpush3.msra.mxu0 %v193_v4  ;;  %471 = vmatpush3.msra.mxu1 %v270_v7 }
  0x1b   : > { %463 = vmatprep.subr.mxu0 %v612_v1  ;;  %p537_p13 = pneg %p536_p12 }
  0x1c   : > { %464 = vmatpush3.msra.mxu0 %v192_v5 }
  0x1d   : > { %466 = vmatmul.mubr.msk.f32.vlgmr.msra.gmra.mxu0 %vm196_vm1, %v191_v6  ;;  %p544_p3 = pnand %p543_p2, %p537_p13 }
  0xdd   : > { %v266_v8 = vpop.f32.mrf.mxu0 }
  0xde   : > { %473 = vmatmul.mubr.msk.f32.vlgmr.msra.gmra.mxu1 %vm273_vm2, %v266_v8 }
  0xdf   : > { %v467_v9 = vpop.f32.mrf.mxu0 }
 0x19e   : > { %v343_v14 = vpop.f32.mrf.mxu1 }
 0x19f   : > { %v344_v15 = vadd.f32 %v343_v14, %v272_v12 }
 0x1a0   : > { %v474_v16 = vpop.f32.mrf.mxu1 }
 0x1a1   : > { %v350_v17 = vrot.slane %v344_v15, %v349_v13 }
 0x1a3   : > { %352 = vbcast.lane.b32.xlu0 %v350_v17, 256 }
 0x1a7   : > { %356 = vbcast.lane.b32.xlu0 %v350_v17, 264 }
 0x215   : > { %v353_v18 = vpop.permute.xlu0 %352 }
 0x216   : > { %358 = vst.msk [vmem:[%s189_s6] sm:$0xff] %vm273_vm2, %v353_v18 }
 0x219   : > { %v357_v19 = vpop.permute.xlu0 %356 }
 0x21a   : > { %359 = vst.msk [vmem:[%s189_s6 + $0x8] sm:$0xff] %vm273_vm2, %v357_v19 }
 0x21b   : > { %547 = shalt.err (!%p544_p3)
}
 0x21c   : > { %s548_s22 = scalar_lea.hbm %s731_s11, 256  ;;  %s552_s29 = scalar_lea.hbm %s783_s4, 512 }
 0x21d   : > { %p549_p5 = scmp.ne.s32.totalorder %s731_s11, %s548_s22  ;;  %p553_p9 = scmp.lt.s32.totalorder %s731_s11, %s783_s4 }
 0x21e   : > { %p554_p10 = scmp.lt.s32.totalorder %s552_s29, %s548_s22 }
 0x21f   : > { %p550_p6 = pnand %p549_p5, %p682_p4 }
 0x220   : > { %p555_p11 = por %p554_p10, %p553_p9 }
 0x221   : > { %p551_p7 = pneg %p550_p6 }
 0x223   : > { %p556_p12 = pnand %p555_p11, %p551_p7 }
 0x225   : > { %559 = shalt.err (!%p556_p12)
}
 0x226   : > { %s615_s6 = smov 128   ;;  %s616_s8 = smov 8  }
 0x227   : > { %475 = dma.vmem_to_hbm [thread:$0]  (%p682_p4), %s726_s7, 256, %s731_s11, %s734_s12, %s615_s6, %s615_s6, %s616_s8  }
 0x228 PF: > { %p481_p13 = scmp.ge.s32.totalorder %s610_s20, 2  ;;  %s390_s9 = sand.u32 1, %s590_s15  }
 0x229   : > { %s391_s10 = scalar_lea.sflag [#allocation3], %s390_s9 }
 0x22a   : > { %p478_p0 = pnand %p481_p13, %p689_p8 }
 0x22c   : > { %p479_p1 = pneg %p478_p0 }
 0x22e   : > { %585 = dma.done.wait (%p479_p1), %s391_s10, 256  }
 0x22f   : > { %587 = vsyncadd (%p479_p1), %s391_s10, 4294967040  ;;  %s17_s20 = sadd.s32 1, %s610_s20   ;;  %s786_s15 = smov %s594_s16 }
 0x230   : > { %p14_p2 = scmp.ge.s32.totalorder %s17_s20, 4   ;;  %s787_s16 = smov %s598_s17 }
 0x231   : > { %s788_s17 = smov %s695_s28  ;;  %s789_s18 = smov %s606_s19 }
 0x232   : > { %s790_s19 = smov %s792_s23  ;;  %16 = sbr.rel (!%p14_p2) target bundleno = 4 (0x4), region = 69 }
 0x237   :  { %396 = vsyncpa [#allocation3], 1 }
 0x238   :  { %398 = vsyncpa [#allocation3 + $0x1], 1 }

</bundles_post_ra>
